<compile_context>
chip_gen: v7x
topology: tpu7x:2x2x1
jax: 0.10.0
libtpu: 0.0.40
codegen_flags: <defaults>
</compile_context>

<pallas_src>
import functools

import jax
import jax.numpy as jnp
from jax import lax
from jax.experimental import pallas as pl
from jax.experimental.pallas import tpu as pltpu

LANE = 128     # pad every feature dim up to a multiple of the TPU lane width
SUBLANE = 8    # batch tile must be a multiple of the sublane count


def _round_up(n, m):
    return ((n + m - 1) // m) * m


def _cdiv(a, b):
    return (a + b - 1) // b


def _leaky_relu(v, slope=0.01):
    return jnp.where(v >= 0, v, slope * v)


def _vae_kernel(n_enc, n_dec, latent_dim, *refs):
    """Fused VAE forward on one batch tile.

    refs layout:
      x, eps,
      [we_i, be_i] * n_enc,          encoder Linear + LeakyReLU
      wmv, bmv,                      fused fc_mu | fc_var (compact, f32)
      [wd_i, bd_i] * n_dec,          decoder Linear + LeakyReLU
                                     (first one has decoder_input folded in)
      wf, bf,                        final Linear + tanh
      recon_out, muvar_out
    """
    it = iter(refs)
    x_ref = next(it)
    eps_ref = next(it)
    enc = [(next(it), next(it)) for _ in range(n_enc)]
    wmv_ref, bmv_ref = next(it), next(it)
    dec = [(next(it), next(it)) for _ in range(n_dec)]
    wf_ref, bf_ref = next(it), next(it)
    recon_ref, muvar_ref = next(it), next(it)

    # MXU dtype taken from the (pre-cast) decoder/encoder weights; the
    # elementwise tail (bias add, exp, tanh, reparameterize) stays in f32.
    cdt = wf_ref.dtype

    # ---- encoder ----
    h = x_ref[...]
    for w_ref, b_ref in enc:
        h = _leaky_relu(
            jnp.dot(h.astype(cdt), w_ref[...], preferred_element_type=jnp.float32)
            + b_ref[...])

    # ---- fused, compact mu | log_var (kept f32 for KL accuracy) ----
    #   lanes [0, L)   : mu
    #   lanes [L, 2L)  : log_var
    #   lanes [2L, mvp): zeros
    muvar = (jnp.dot(h, wmv_ref[...], preferred_element_type=jnp.float32)
             + bmv_ref[...])

    # ---- reparameterize, still in the compact layout ----
    # eps is pre-shifted by the wrapper into lanes [L, 2L); the first decoder
    # weight has its real rows duplicated at [0,L) and [L,2L), so
    #   z_slab @ W  ==  (mu + eps*std) @ W_real  (the reference decode input).
    lane = lax.broadcasted_iota(jnp.int32, muvar.shape, 1)
    mu_only = jnp.where(lane < latent_dim, muvar, 0.0)
    logvar_only = muvar - mu_only          # log_var at [L,2L), zero elsewhere
    z = eps_ref[...].astype(jnp.float32) * jnp.exp(0.5 * logvar_only) + mu_only

    # ---- decode ----
    d = z
    for w_ref, b_ref in dec:
        d = _leaky_relu(
            jnp.dot(d.astype(cdt), w_ref[...], preferred_element_type=jnp.float32)
            + b_ref[...])
    recon = jnp.tanh(
        jnp.dot(d.astype(cdt), wf_ref[...], preferred_element_type=jnp.float32)
        + bf_ref[...])

    recon_ref[...] = recon.astype(recon_ref.dtype)
    muvar_ref[...] = muvar.astype(muvar_ref.dtype)


def prepare_params(params, input_dim, hidden_dims, latent_dim,
                   compute_dtype=jnp.float32):
    """Zero-pad feature dims to multiples of 128 lanes, build the compact
    fc_mu|fc_var weight, fold decoder_input into the next Linear (in f32), and
    cast matmul weights to compute_dtype (biases and fc_mu|fc_var stay f32)."""
    n = len(hidden_dims)
    L = latent_dim
    ip = _round_up(input_dim, LANE)
    hp = [_round_up(h, LANE) for h in hidden_dims]
    mvp = _round_up(2 * latent_dim, LANE)

    def pad_w(w, rows, cols, dtype=compute_dtype):
        w = w.astype(jnp.float32)
        return jnp.pad(w, ((0, rows - w.shape[0]),
                           (0, cols - w.shape[1]))).astype(dtype)

    def pad_b(b, cols):
        b = b.astype(jnp.float32)
        return jnp.pad(b, ((0, 0), (0, cols - b.shape[1])))

    packed = []
    # encoder layers
    dims = [ip] + hp
    for i in range(n):
        packed.append(pad_w(params[f"we{i}"], dims[i], dims[i + 1]))
        packed.append(pad_b(params[f"be{i}"], dims[i + 1]))

    # fused fc_mu | fc_var, compact: mu cols [0,L), log_var cols [L,2L).  f32.
    wmv = jnp.zeros((hp[-1], mvp), jnp.float32)
    wmv = wmv.at[:params["wmu"].shape[0], :L].set(params["wmu"].astype(jnp.float32))
    wmv = wmv.at[:params["wvar"].shape[0], L:2 * L].set(
        params["wvar"].astype(jnp.float32))
    bmv = jnp.zeros((1, mvp), jnp.float32)
    bmv = bmv.at[:, :L].set(params["bmu"].astype(jnp.float32))
    bmv = bmv.at[:, L:2 * L].set(params["bvar"].astype(jnp.float32))
    packed += [wmv, bmv]

    # decoder_input is a pure Linear -> fold it (in f32, before any bf16 cast)
    # into the next Linear.  Real rows are duplicated at [0,L) and [L,2L) of
    # the compact latent slab (mu-part and eps*std-part of z_slab).
    rh = hidden_dims[::-1]
    rhp = hp[::-1]
    wdi = params["wdi"].astype(jnp.float32)
    bdi = params["bdi"].astype(jnp.float32)
    if n >= 2:
        w_next = params["wd0"].astype(jnp.float32)
        b_next = params["bd0"].astype(jnp.float32)
        out_dim, out_pad = rh[1], rhp[1]
    else:
        w_next = params["wf"].astype(jnp.float32)
        b_next = params["bf"].astype(jnp.float32)
        out_dim, out_pad = input_dim, ip
    w_fused = wdi @ w_next                       # [L, out_dim]
    b_fused = bdi @ w_next + b_next              # [1, out_dim]
    w_dup = jnp.zeros((mvp, out_pad), jnp.float32)
    w_dup = w_dup.at[:L, :out_dim].set(w_fused)
    w_dup = w_dup.at[L:2 * L, :out_dim].set(w_fused)
    b_dup = jnp.pad(b_fused, ((0, 0), (0, out_pad - out_dim)))

    if n >= 2:
        # first decoder layer = fused (decoder_input o decoder[0]) + LeakyReLU
        packed += [w_dup.astype(compute_dtype), b_dup]
        for i in range(1, n - 1):
            packed.append(pad_w(params[f"wd{i}"], rhp[i], rhp[i + 1]))
            packed.append(pad_b(params[f"bd{i}"], rhp[i + 1]))
        packed.append(pad_w(params["wf"], rhp[-1], ip))
        packed.append(pad_b(params["bf"], ip))
    else:
        # no decoder hidden layers: fused (decoder_input o final) + tanh
        packed += [w_dup.astype(compute_dtype), b_dup]

    return packed, (ip, hp, mvp)


def annealed_vae_forward(x, eps, params, input_dim, hidden_dims, latent_dim,
                         *, compute_dtype=jnp.float32, batch_tile=1024):
    """Run the fused VAE forward. x: [B, input_dim], eps: [B, latent_dim].

    compute_dtype: jnp.float32 (exact) or jnp.bfloat16 — bf16 weights + bf16
                   streamed x/eps/recon (recommended on all generations incl.
                   v5e; the elementwise tail and the mu|log_var matmul stay f32).
    batch_tile:    max rows per grid step (default 1024); the actual tile is
                   adapted to the batch size and kept to >= 2 grid steps when
                   the batch can be split (v7x: one step per TensorCore).
    """
    B = x.shape[0]
    n = len(hidden_dims)
    packed, (ip, hp, mvp) = prepare_params(
        params, input_dim, hidden_dims, latent_dim, compute_dtype)

    io_dtype = jnp.bfloat16 if compute_dtype == jnp.bfloat16 else jnp.float32

    # Adaptive batch tile (multiple of 8 sublanes, no huge zero-padded tiles).
    tb = min(batch_tile, _round_up(max(B, 1), SUBLANE))
    if tb > SUBLANE and _cdiv(max(B, 1), tb) < 2:
        tb = _round_up(_cdiv(tb, 2), SUBLANE)     # keep >= 2 pipelined steps
    bp = _round_up(max(B, 1), tb)

    x_p = jnp.pad(x, ((0, bp - B), (0, ip - input_dim))).astype(io_dtype)
    # eps lives in lanes [L, 2L) of the compact latent slab (see kernel).
    eps_p = jnp.pad(eps, ((0, bp - B),
                          (latent_dim, mvp - 2 * latent_dim))).astype(io_dtype)

    row = lambda i: (i, 0)     # streamed over the batch grid
    fixed = lambda i: (0, 0)   # resident in VMEM (DMA'd once)

    in_specs = [pl.BlockSpec((tb, ip), row), pl.BlockSpec((tb, mvp), row)]
    in_specs += [pl.BlockSpec(w.shape, fixed) for w in packed]

    out_specs = (pl.BlockSpec((tb, ip), row),
                 pl.BlockSpec((tb, mvp), row))
    out_shape = (jax.ShapeDtypeStruct((bp, ip), io_dtype),
                 jax.ShapeDtypeStruct((bp, mvp), jnp.float32))

    # Advisory cost estimate so XLA schedules the wrapper pads/slices sensibly.
    weights = [w for k, w in enumerate(packed) if k % 2 == 0]
    flops = 2 * bp * sum(int(w.shape[0]) * int(w.shape[1]) for w in weights)
    transcendentals = bp * (mvp + ip)             # exp + tanh
    bytes_accessed = (
        x_p.size * x_p.dtype.itemsize + eps_p.size * eps_p.dtype.itemsize
        + bp * ip * jnp.dtype(io_dtype).itemsize + bp * mvp * 4
        + sum(w.size * w.dtype.itemsize for w in packed))

    kernel = functools.partial(_vae_kernel, n, n - 1, latent_dim)
    recon_p, muvar_p = pl.pallas_call(
        kernel,
        grid=(bp // tb,),
        in_specs=in_specs,
        out_specs=out_specs,
        out_shape=out_shape,
        compiler_params=pltpu.CompilerParams(
            dimension_semantics=("parallel",)),   # shards batch over v7x's 2 TCs
        cost_estimate=pl.CostEstimate(
            flops=int(flops), transcendentals=int(transcendentals),
            bytes_accessed=int(bytes_accessed)),
    )(x_p, eps_p, *packed)

    recon = recon_p[:B, :input_dim].astype(jnp.float32)
    mu = muvar_p[:B, :latent_dim]
    logvar = muvar_p[:B, latent_dim:2 * latent_dim]
    return recon, mu, logvar


def init_params(key, input_dim, hidden_dims, latent_dim):
    """Deterministic parameter init (uniform +-1/sqrt(fan_in), like torch default)."""
    params = {}

    def linear(key, fan_in, fan_out):
        kw, kb = jax.random.split(key)
        bound = 1.0 / jnp.sqrt(fan_in)
        w = jax.random.uniform(kw, (fan_in, fan_out), jnp.float32, -bound, bound)
        b = jax.random.uniform(kb, (1, fan_out), jnp.float32, -bound, bound)
        return w, b

    n = len(hidden_dims)
    keys = iter(jax.random.split(key, 2 * n + 3))
    in_dim = input_dim
    for i, h in enumerate(hidden_dims):
        params[f"we{i}"], params[f"be{i}"] = linear(next(keys), in_dim, h)
        in_dim = h
    params["wmu"], params["bmu"] = linear(next(keys), hidden_dims[-1], latent_dim)
    params["wvar"], params["bvar"] = linear(next(keys), hidden_dims[-1], latent_dim)
    rh = hidden_dims[::-1]
    params["wdi"], params["bdi"] = linear(next(keys), latent_dim, rh[0])
    for i in range(n - 1):
        params[f"wd{i}"], params[f"bd{i}"] = linear(next(keys), rh[i], rh[i + 1])
    params["wf"], params["bf"] = linear(next(keys), rh[-1], input_dim)
    return params


def reference_forward(x, eps, params, hidden_dims):
    """Plain-JAX reference (mirrors the PyTorch module) for correctness checks."""
    lr = lambda v: jnp.where(v >= 0, v, 0.01 * v)
    h = x
    for i in range(len(hidden_dims)):
        h = lr(h @ params[f"we{i}"] + params[f"be{i}"])
    mu = h @ params["wmu"] + params["bmu"]
    logvar = h @ params["wvar"] + params["bvar"]
    z = eps * jnp.exp(0.5 * logvar) + mu
    d = z @ params["wdi"] + params["bdi"]
    for i in range(len(hidden_dims) - 1):
        d = lr(d @ params[f"wd{i}"] + params[f"bd{i}"])
    recon = jnp.tanh(d @ params["wf"] + params["bf"])
    return recon, mu, logvar


if __name__ == "__main__":
    # Small shapes consistent with the module's [N x C] MLP-VAE forward.
    B = 2
    INPUT_DIM = 128
    HIDDEN_DIMS = [64, 32]
    LATENT_DIM = 16

    key = jax.random.PRNGKey(0)
    kx, keps, kp = jax.random.split(key, 3)

    x = jax.random.normal(kx, (B, INPUT_DIM), jnp.float32)
    # reparameterize() draws eps ~ N(0,1) with torch.randn_like; drawn here
    # deterministically and fed to the kernel (keeps bit-level parity testable).
    eps = jax.random.normal(keps, (B, LATENT_DIM), jnp.float32)
    params = init_params(kp, INPUT_DIM, HIDDEN_DIMS, LATENT_DIM)

    # f32 path: zero-padding + the f32 decoder_input fusion are (numerically)
    # exact, so this matches the unpadded reference.
    recon, mu, logvar = annealed_vae_forward(
        x, eps, params, INPUT_DIM, HIDDEN_DIMS, LATENT_DIM,
        compute_dtype=jnp.float32)
    jax.block_until_ready((recon, mu, logvar))

    r_ref, m_ref, lv_ref = reference_forward(x, eps, params, HIDDEN_DIMS)
    assert recon.shape == (B, INPUT_DIM)
    assert mu.shape == (B, LATENT_DIM) and logvar.shape == (B, LATENT_DIM)
    assert jnp.allclose(mu, m_ref, atol=2e-4)
    assert jnp.allclose(logvar, lv_ref, atol=2e-4)
    assert jnp.allclose(recon, r_ref, atol=5e-4)

    # bf16 fast path (halves streamed HBM bytes; mu/log_var matmul stays f32) —
    # sanity check only (reduced precision through the encoder).
    recon_bf, mu_bf, lv_bf = annealed_vae_forward(
        x, eps, params, INPUT_DIM, HIDDEN_DIMS, LATENT_DIM,
        compute_dtype=jnp.bfloat16)
    jax.block_until_ready((recon_bf, mu_bf, lv_bf))
    assert recon_bf.shape == (B, INPUT_DIM)
    assert bool(jnp.all(jnp.isfinite(recon_bf))) and bool(jnp.all(jnp.isfinite(mu_bf)))
    assert jnp.allclose(recon_bf, r_ref, atol=1e-1)

    print("KERNEL_OK")
</pallas_src>

<mosaic_0001>
module attributes {stable_mosaic.version = 11 : i64} {
  func.func @_vae_kernel(%arg0: i32, %arg1: memref<8x128xf32, #tpu.memory_space<vmem>>, %arg2: memref<8x128xf32, #tpu.memory_space<vmem>>, %arg3: memref<128x128xf32, #tpu.memory_space<vmem>>, %arg4: memref<1x128xf32, #tpu.memory_space<vmem>>, %arg5: memref<128x128xf32, #tpu.memory_space<vmem>>, %arg6: memref<1x128xf32, #tpu.memory_space<vmem>>, %arg7: memref<128x128xf32, #tpu.memory_space<vmem>>, %arg8: memref<1x128xf32, #tpu.memory_space<vmem>>, %arg9: memref<128x128xf32, #tpu.memory_space<vmem>>, %arg10: memref<1x128xf32, #tpu.memory_space<vmem>>, %arg11: memref<128x128xf32, #tpu.memory_space<vmem>>, %arg12: memref<1x128xf32, #tpu.memory_space<vmem>>, %arg13: memref<8x128xf32, #tpu.memory_space<vmem>>, %arg14: memref<8x128xf32, #tpu.memory_space<vmem>>) attributes {dimension_semantics = [#tpu.dimension_semantics<parallel>], iteration_bounds = array<i64: 1>, scalar_prefetch = 0 : i64, scratch_operands = 0 : i64, tpu.core_type = #tpu.core_type<tc>, window_params = [{transform_indices = @transform_0, window_bounds = array<i64: 8, 128>}, {transform_indices = @transform_1, window_bounds = array<i64: 8, 128>}, {pipeline_mode = #tpu.pipeline_mode<synchronous>, transform_indices = @transform_2, window_bounds = array<i64: 128, 128>}, {pipeline_mode = #tpu.pipeline_mode<synchronous>, transform_indices = @transform_3, window_bounds = array<i64: 1, 128>}, {pipeline_mode = #tpu.pipeline_mode<synchronous>, transform_indices = @transform_4, window_bounds = array<i64: 128, 128>}, {pipeline_mode = #tpu.pipeline_mode<synchronous>, transform_indices = @transform_5, window_bounds = array<i64: 1, 128>}, {pipeline_mode = #tpu.pipeline_mode<synchronous>, transform_indices = @transform_6, window_bounds = array<i64: 128, 128>}, {pipeline_mode = #tpu.pipeline_mode<synchronous>, transform_indices = @transform_7, window_bounds = array<i64: 1, 128>}, {pipeline_mode = #tpu.pipeline_mode<synchronous>, transform_indices = @transform_8, window_bounds = array<i64: 128, 128>}, {pipeline_mode = #tpu.pipeline_mode<synchronous>, transform_indices = @transform_9, window_bounds = array<i64: 1, 128>}, {pipeline_mode = #tpu.pipeline_mode<synchronous>, transform_indices = @transform_10, window_bounds = array<i64: 128, 128>}, {pipeline_mode = #tpu.pipeline_mode<synchronous>, transform_indices = @transform_11, window_bounds = array<i64: 1, 128>}, {transform_indices = @transform_12, window_bounds = array<i64: 8, 128>}, {transform_indices = @transform_13, window_bounds = array<i64: 8, 128>}]} {
    %c0 = arith.constant 0 : index
    %c0_0 = arith.constant 0 : index
    %0 = vector.load %arg1[%c0, %c0_0] : memref<8x128xf32, #tpu.memory_space<vmem>>, vector<8x128xf32>
    %c0_1 = arith.constant 0 : index
    %c0_2 = arith.constant 0 : index
    %1 = vector.load %arg3[%c0_1, %c0_2] : memref<128x128xf32, #tpu.memory_space<vmem>>, vector<128x128xf32>
    %cst = arith.constant dense<0.000000e+00> : vector<8x128xf32>
    %2 = tpu.matmul %0, %1, %cst {dimension_numbers = #tpu.dot_dimension_numbers<[1], [0], [0], [1], [0, 0, 1, 1], [], []>} : vector<8x128xf32>, vector<128x128xf32>, vector<8x128xf32> -> vector<8x128xf32>
    %c0_3 = arith.constant 0 : index
    %c0_4 = arith.constant 0 : index
    %3 = vector.load %arg4[%c0_3, %c0_4] : memref<1x128xf32, #tpu.memory_space<vmem>>, vector<1x128xf32>
    %4 = vector.broadcast %3 : vector<1x128xf32> to vector<8x128xf32>
    %5 = arith.addf %2, %4 : vector<8x128xf32>
    %cst_5 = arith.constant 0.000000e+00 : f32
    %6 = vector.broadcast %cst_5 : f32 to vector<8x128xf32>
    %7 = arith.cmpf oge, %5, %6 : vector<8x128xf32>
    %cst_6 = arith.constant 0.00999999977 : f32
    %8 = vector.broadcast %cst_6 : f32 to vector<8x128xf32>
    %9 = arith.mulf %8, %5 : vector<8x128xf32>
    %10 = arith.select %7, %5, %9 : vector<8x128xi1>, vector<8x128xf32>
    %c0_7 = arith.constant 0 : index
    %c0_8 = arith.constant 0 : index
    %11 = vector.load %arg5[%c0_7, %c0_8] : memref<128x128xf32, #tpu.memory_space<vmem>>, vector<128x128xf32>
    %cst_9 = arith.constant dense<0.000000e+00> : vector<8x128xf32>
    %12 = tpu.matmul %10, %11, %cst_9 {dimension_numbers = #tpu.dot_dimension_numbers<[1], [0], [0], [1], [0, 0, 1, 1], [], []>} : vector<8x128xf32>, vector<128x128xf32>, vector<8x128xf32> -> vector<8x128xf32>
    %c0_10 = arith.constant 0 : index
    %c0_11 = arith.constant 0 : index
    %13 = vector.load %arg6[%c0_10, %c0_11] : memref<1x128xf32, #tpu.memory_space<vmem>>, vector<1x128xf32>
    %14 = vector.broadcast %13 : vector<1x128xf32> to vector<8x128xf32>
    %15 = arith.addf %12, %14 : vector<8x128xf32>
    %cst_12 = arith.constant 0.000000e+00 : f32
    %16 = vector.broadcast %cst_12 : f32 to vector<8x128xf32>
    %17 = arith.cmpf oge, %15, %16 : vector<8x128xf32>
    %cst_13 = arith.constant 0.00999999977 : f32
    %18 = vector.broadcast %cst_13 : f32 to vector<8x128xf32>
    %19 = arith.mulf %18, %15 : vector<8x128xf32>
    %20 = arith.select %17, %15, %19 : vector<8x128xi1>, vector<8x128xf32>
    %c0_14 = arith.constant 0 : index
    %c0_15 = arith.constant 0 : index
    %21 = vector.load %arg7[%c0_14, %c0_15] : memref<128x128xf32, #tpu.memory_space<vmem>>, vector<128x128xf32>
    %cst_16 = arith.constant dense<0.000000e+00> : vector<8x128xf32>
    %22 = tpu.matmul %20, %21, %cst_16 {dimension_numbers = #tpu.dot_dimension_numbers<[1], [0], [0], [1], [0, 0, 1, 1], [], []>} : vector<8x128xf32>, vector<128x128xf32>, vector<8x128xf32> -> vector<8x128xf32>
    %c0_17 = arith.constant 0 : index
    %c0_18 = arith.constant 0 : index
    %23 = vector.load %arg8[%c0_17, %c0_18] : memref<1x128xf32, #tpu.memory_space<vmem>>, vector<1x128xf32>
    %24 = vector.broadcast %23 : vector<1x128xf32> to vector<8x128xf32>
    %25 = arith.addf %22, %24 : vector<8x128xf32>
    %26 = tpu.iota {dimensions = array<i32: 1>} : vector<8x128xi32>
    %c16_i32 = arith.constant 16 : i32
    %27 = vector.broadcast %c16_i32 : i32 to vector<8x128xi32>
    %28 = arith.cmpi slt, %26, %27 : vector<8x128xi32>
    %cst_19 = arith.constant 0.000000e+00 : f32
    %29 = vector.broadcast %cst_19 : f32 to vector<8x128xf32>
    %30 = arith.select %28, %25, %29 : vector<8x128xi1>, vector<8x128xf32>
    %31 = arith.subf %25, %30 : vector<8x128xf32>
    %c0_20 = arith.constant 0 : index
    %c0_21 = arith.constant 0 : index
    %32 = vector.load %arg2[%c0_20, %c0_21] : memref<8x128xf32, #tpu.memory_space<vmem>>, vector<8x128xf32>
    %cst_22 = arith.constant 5.000000e-01 : f32
    %33 = vector.broadcast %cst_22 : f32 to vector<8x128xf32>
    %34 = arith.mulf %33, %31 : vector<8x128xf32>
    %35 = math.exp %34 : vector<8x128xf32>
    %36 = arith.mulf %32, %35 : vector<8x128xf32>
    %37 = arith.addf %36, %30 : vector<8x128xf32>
    %c0_23 = arith.constant 0 : index
    %c0_24 = arith.constant 0 : index
    %38 = vector.load %arg9[%c0_23, %c0_24] : memref<128x128xf32, #tpu.memory_space<vmem>>, vector<128x128xf32>
    %cst_25 = arith.constant dense<0.000000e+00> : vector<8x128xf32>
    %39 = tpu.matmul %37, %38, %cst_25 {dimension_numbers = #tpu.dot_dimension_numbers<[1], [0], [0], [1], [0, 0, 1, 1], [], []>} : vector<8x128xf32>, vector<128x128xf32>, vector<8x128xf32> -> vector<8x128xf32>
    %c0_26 = arith.constant 0 : index
    %c0_27 = arith.constant 0 : index
    %40 = vector.load %arg10[%c0_26, %c0_27] : memref<1x128xf32, #tpu.memory_space<vmem>>, vector<1x128xf32>
    %41 = vector.broadcast %40 : vector<1x128xf32> to vector<8x128xf32>
    %42 = arith.addf %39, %41 : vector<8x128xf32>
    %cst_28 = arith.constant 0.000000e+00 : f32
    %43 = vector.broadcast %cst_28 : f32 to vector<8x128xf32>
    %44 = arith.cmpf oge, %42, %43 : vector<8x128xf32>
    %cst_29 = arith.constant 0.00999999977 : f32
    %45 = vector.broadcast %cst_29 : f32 to vector<8x128xf32>
    %46 = arith.mulf %45, %42 : vector<8x128xf32>
    %47 = arith.select %44, %42, %46 : vector<8x128xi1>, vector<8x128xf32>
    %c0_30 = arith.constant 0 : index
    %c0_31 = arith.constant 0 : index
    %48 = vector.load %arg11[%c0_30, %c0_31] : memref<128x128xf32, #tpu.memory_space<vmem>>, vector<128x128xf32>
    %cst_32 = arith.constant dense<0.000000e+00> : vector<8x128xf32>
    %49 = tpu.matmul %47, %48, %cst_32 {dimension_numbers = #tpu.dot_dimension_numbers<[1], [0], [0], [1], [0, 0, 1, 1], [], []>} : vector<8x128xf32>, vector<128x128xf32>, vector<8x128xf32> -> vector<8x128xf32>
    %c0_33 = arith.constant 0 : index
    %c0_34 = arith.constant 0 : index
    %50 = vector.load %arg12[%c0_33, %c0_34] : memref<1x128xf32, #tpu.memory_space<vmem>>, vector<1x128xf32>
    %51 = vector.broadcast %50 : vector<1x128xf32> to vector<8x128xf32>
    %52 = arith.addf %49, %51 : vector<8x128xf32>
    %53 = math.tanh %52 : vector<8x128xf32>
    %c0_35 = arith.constant 0 : index
    %c0_36 = arith.constant 0 : index
    %54 = vector.load %arg13[%c0_35, %c0_36] : memref<8x128xf32, #tpu.memory_space<vmem>>, vector<8x128xf32>
    tpu.vector_store %arg13[%c0_35, %c0_36], %53 {strides = array<i32>} : memref<8x128xf32, #tpu.memory_space<vmem>>, vector<8x128xf32>,
    %c0_37 = arith.constant 0 : index
    %c0_38 = arith.constant 0 : index
    %55 = vector.load %arg14[%c0_37, %c0_38] : memref<8x128xf32, #tpu.memory_space<vmem>>, vector<8x128xf32>
    tpu.vector_store %arg14[%c0_37, %c0_38], %25 {strides = array<i32>} : memref<8x128xf32, #tpu.memory_space<vmem>>, vector<8x128xf32>,
    return
  }
  func.func @transform_0(%arg0: i32) -> (i32, i32) {
    %c0_i32 = arith.constant 0 : i32
    %c0_i32_0 = arith.constant 0 : i32
    return %arg0, %c0_i32 : i32, i32
  }
  func.func @transform_1(%arg0: i32) -> (i32, i32) {
    %c0_i32 = arith.constant 0 : i32
    %c0_i32_0 = arith.constant 0 : i32
    return %arg0, %c0_i32 : i32, i32
  }
  func.func @transform_2(%arg0: i32) -> (i32, i32) {
    %c0_i32 = arith.constant 0 : i32
    %c0_i32_0 = arith.constant 0 : i32
    %c0_i32_1 = arith.constant 0 : i32
    return %c0_i32, %c0_i32_0 : i32, i32
  }
  func.func @transform_3(%arg0: i32) -> (i32, i32) {
    %c0_i32 = arith.constant 0 : i32
    %c0_i32_0 = arith.constant 0 : i32
    %c0_i32_1 = arith.constant 0 : i32
    return %c0_i32, %c0_i32_0 : i32, i32
  }
  func.func @transform_4(%arg0: i32) -> (i32, i32) {
    %c0_i32 = arith.constant 0 : i32
    %c0_i32_0 = arith.constant 0 : i32
    %c0_i32_1 = arith.constant 0 : i32
    return %c0_i32, %c0_i32_0 : i32, i32
  }
  func.func @transform_5(%arg0: i32) -> (i32, i32) {
    %c0_i32 = arith.constant 0 : i32
    %c0_i32_0 = arith.constant 0 : i32
    %c0_i32_1 = arith.constant 0 : i32
    return %c0_i32, %c0_i32_0 : i32, i32
  }
  func.func @transform_6(%arg0: i32) -> (i32, i32) {
    %c0_i32 = arith.constant 0 : i32
    %c0_i32_0 = arith.constant 0 : i32
    %c0_i32_1 = arith.constant 0 : i32
    return %c0_i32, %c0_i32_0 : i32, i32
  }
  func.func @transform_7(%arg0: i32) -> (i32, i32) {
    %c0_i32 = arith.constant 0 : i32
    %c0_i32_0 = arith.constant 0 : i32
    %c0_i32_1 = arith.constant 0 : i32
    return %c0_i32, %c0_i32_0 : i32, i32
  }
  func.func @transform_8(%arg0: i32) -> (i32, i32) {
    %c0_i32 = arith.constant 0 : i32
    %c0_i32_0 = arith.constant 0 : i32
    %c0_i32_1 = arith.constant 0 : i32
    return %c0_i32, %c0_i32_0 : i32, i32
  }
  func.func @transform_9(%arg0: i32) -> (i32, i32) {
    %c0_i32 = arith.constant 0 : i32
    %c0_i32_0 = arith.constant 0 : i32
    %c0_i32_1 = arith.constant 0 : i32
    return %c0_i32, %c0_i32_0 : i32, i32
  }
  func.func @transform_10(%arg0: i32) -> (i32, i32) {
    %c0_i32 = arith.constant 0 : i32
    %c0_i32_0 = arith.constant 0 : i32
    %c0_i32_1 = arith.constant 0 : i32
    return %c0_i32, %c0_i32_0 : i32, i32
  }
  func.func @transform_11(%arg0: i32) -> (i32, i32) {
    %c0_i32 = arith.constant 0 : i32
    %c0_i32_0 = arith.constant 0 : i32
    %c0_i32_1 = arith.constant 0 : i32
    return %c0_i32, %c0_i32_0 : i32, i32
  }
  func.func @transform_12(%arg0: i32) -> (i32, i32) {
    %c0_i32 = arith.constant 0 : i32
    %c0_i32_0 = arith.constant 0 : i32
    return %arg0, %c0_i32 : i32, i32
  }
  func.func @transform_13(%arg0: i32) -> (i32, i32) {
    %c0_i32 = arith.constant 0 : i32
    %c0_i32_0 = arith.constant 0 : i32
    return %arg0, %c0_i32 : i32, i32
  }
}

</mosaic_0001>

<bundles_post_ra>
// kernel: tpu_custom_call.1
= control target key start
LH: loop header
LB: loop body
LE: loop exit
PB: predicated region body
PF: predicated region fallthrough
CT: control target
= control target key end

     0   :  { %19 = vsyncpa [#allocation3], 0  ;;  %s1542_s0 = inlined_call_operand.hbm [shape: f32[8,128], index: 0, kind: input, shape index: {}]   ;;  %s1543_s1 = inlined_call_operand.hbm [shape: f32[8,128], index: 1, kind: input, shape index: {}]   ;;  %s1544_s2 = inlined_call_operand.hbm [shape: f32[128,128], index: 2, kind: input, shape index: {}]   ;;  %s1545_s3 = inlined_call_operand.vmem [shape: f32[1,128], index: 3, kind: input, shape index: {}]   ;;  %s1546_s4 = inlined_call_operand.hbm [shape: f32[128,128], index: 4, kind: input, shape index: {}]   ;;  %s1547_s5 = inlined_call_operand.vmem [shape: f32[1,128], index: 5, kind: input, shape index: {}]   ;;  %s1548_s6 = inlined_call_operand.hbm [shape: f32[128,128], index: 6, kind: input, shape index: {}]   ;;  %s1549_s7 = inlined_call_operand.vmem [shape: f32[1,128], index: 7, kind: input, shape index: {}]   ;;  %s1550_s8 = inlined_call_operand.hbm [shape: f32[128,128], index: 8, kind: input, shape index: {}]   ;;  %s1551_s9 = inlined_call_operand.vmem [shape: f32[1,128], index: 9, kind: input, shape index: {}]   ;;  %s1552_s10 = inlined_call_operand.hbm [shape: f32[128,128], index: 10, kind: input, shape index: {}]   ;;  %s1553_s11 = inlined_call_operand.vmem [shape: f32[1,128], index: 11, kind: input, shape index: {}]   ;;  %s1554_s12 = inlined_call_operand.hbm [shape: f32[8,128], index: 12, kind: output, shape index: {0}]   ;;  %s1555_s13 = inlined_call_operand.hbm [shape: f32[8,128], index: 13, kind: output, shape index: {1}]  }
   0x1   :  { %20 = vsyncpa [#allocation6], 0 }
   0x2   :  { %21 = vsyncpa [#allocation9], 0 }
   0x3   :  { %22 = vsyncpa [#allocation12], 0 }
   0x4   :  { %23 = vsyncpa [#allocation4], 0 }
   0x5   :  { %24 = vsyncpa [#allocation16], 0  ;;  %s1270_s25 = smov [#allocation5]   ;;  %s1060_s29 = scalar_lea.hbm %s1543_s1, 128 }
   0x6   :  { %s41_s26 = sshll.u32 %s1270_s25, 4  ;;  %p1061_p0 = scmp.ne.s32.totalorder %s1543_s1, %s1060_s29  ;;  %s42_s26 = int_to_ptr.vmem [resolvable:$true] %s41_s26 }
   0x7   :  { %p1064_p1 = scmp.lt.u32.totalorder %s1060_s29, %s1543_s1 }
   0x9   :  { %p1066_p2 = pnand %p1064_p1, %p1061_p0 }
   0xb   :  { %1069 = shalt.err (!%p1066_p2)
}
   0xc   :  { %s1070_s17 = scalar_lea.vmem %s42_s26, 128  ;;  %p1075_p4 = scmp.lt.s32.totalorder %s42_s26, %s42_s26 }
   0xd   :  { %p1071_p3 = scmp.ne.s32.totalorder %s42_s26, %s1070_s17  ;;  %p1076_p5 = scmp.lt.s32.totalorder %s1070_s17, %s1070_s17 }
   0xf   :  { %p1077_p6 = por %p1076_p5, %p1075_p4 }
  0x11   :  { %p1078_p7 = pnand %p1077_p6, %p1071_p3 }
  0x13   :  { %1081 = shalt.err (!%p1078_p7)
}
  0x14   :  { %44 = dma.hbm_to_vmem [thread:$0]  %s1543_s1, 128, %s42_s26, [#allocation6]  }
  0x15   :  { %s1271_s20 = smov [#allocation8]   ;;  %s1272_s22 = smov [#allocation11]  }
  0x16   :  { %s64_s21 = sshll.u32 %s1271_s20, 4  ;;  %s92_s23 = sshll.u32 %s1272_s22, 4  ;;  %s65_s21 = int_to_ptr.vmem [resolvable:$true] %s64_s21  ;;  %s93_s23 = int_to_ptr.vmem [resolvable:$true] %s92_s23 }
  0x17   :  { %s1082_s27 = scalar_lea.hbm %s1546_s4, 2048 }
  0x18   :  { %p1083_p8 = scmp.ne.s32.totalorder %s1546_s4, %s1082_s27  ;;  %p1086_p9 = scmp.lt.u32.totalorder %s1082_s27, %s1546_s4 }
  0x1a   :  { %p1088_p10 = pnand %p1086_p9, %p1083_p8 }
  0x1c   :  { %1091 = shalt.err (!%p1088_p10)
}
  0x1d   :  { %s1092_s1 = scalar_lea.vmem %s65_s21, 2048  ;;  %p1097_p12 = scmp.lt.s32.totalorder %s65_s21, %s65_s21 }
  0x1e   :  { %p1093_p11 = scmp.ne.s32.totalorder %s65_s21, %s1092_s1  ;;  %p1098_p13 = scmp.lt.s32.totalorder %s1092_s1, %s1092_s1 }
  0x20   :  { %p1099_p0 = por %p1098_p13, %p1097_p12 }
  0x22   :  { %p1100_p1 = pnand %p1099_p0, %p1093_p11 }
  0x24   :  { %1103 = shalt.err (!%p1100_p1)
}
  0x25   :  { %s1273_s26 = smov 128   ;;  %s1274_s15 = smov 8  }
  0x26   :  { %70 = dma.hbm_to_vmem [thread:$0]  %s1546_s4, 2048, %s65_s21, [#allocation9], %s1273_s26, %s1273_s26, %s1274_s15  }
  0x27   :  { %s1104_s20 = scalar_lea.hbm %s1550_s8, 2048 }
  0x28   :  { %p1105_p2 = scmp.ne.s32.totalorder %s1550_s8, %s1104_s20  ;;  %p1108_p3 = scmp.lt.u32.totalorder %s1104_s20, %s1550_s8 }
  0x2a   :  { %p1110_p4 = pnand %p1108_p3, %p1105_p2 }
  0x2c   :  { %1113 = shalt.err (!%p1110_p4)
}
  0x2d   :  { %s1114_s28 = scalar_lea.vmem %s93_s23, 2048  ;;  %p1119_p6 = scmp.lt.s32.totalorder %s93_s23, %s93_s23 }
  0x2e   :  { %p1115_p5 = scmp.ne.s32.totalorder %s93_s23, %s1114_s28  ;;  %p1120_p7 = scmp.lt.s32.totalorder %s1114_s28, %s1114_s28 }
  0x30   :  { %p1121_p8 = por %p1120_p7, %p1119_p6 }
  0x32   :  { %p1122_p9 = pnand %p1121_p8, %p1115_p5 }
  0x34   :  { %1125 = shalt.err (!%p1122_p9)
}
  0x35   :  { %98 = dma.hbm_to_vmem [thread:$0]  %s1550_s8, 2048, %s93_s23, [#allocation12], %s1273_s26, %s1273_s26, %s1274_s15  }
  0x36   :  { %s1275_s29 = smov [#allocation2]   ;;  %s1276_s14 = smov [#allocation7]  }
  0x37   :  { %s31_s30 = sshll.u32 %s1275_s29, 4  ;;  %s50_s1 = sshll.u32 %s1276_s14, 4  ;;  %s32_s30 = int_to_ptr.vmem [resolvable:$true] %s31_s30  ;;  %s51_s1 = int_to_ptr.vmem [resolvable:$true] %s50_s1 }
  0x38   :  { %s1126_s18 = scalar_lea.hbm %s1542_s0, 128 }
  0x39   :  { %p1127_p10 = scmp.ne.s32.totalorder %s1542_s0, %s1126_s18  ;;  %p1130_p11 = scmp.lt.u32.totalorder %s1126_s18, %s1542_s0 }
  0x3b   :  { %p1132_p12 = pnand %p1130_p11, %p1127_p10 }
  0x3d   :  { %1135 = shalt.err (!%p1132_p12)
}
  0x3e   :  { %s1136_s8 = scalar_lea.vmem %s32_s30, 128  ;;  %p1141_p0 = scmp.lt.s32.totalorder %s32_s30, %s32_s30 }
  0x3f   :  { %p1137_p13 = scmp.ne.s32.totalorder %s32_s30, %s1136_s8  ;;  %p1142_p1 = scmp.lt.s32.totalorder %s1136_s8, %s1136_s8 }
  0x41   :  { %p1143_p2 = por %p1142_p1, %p1141_p0 }
  0x43   :  { %p1144_p3 = pnand %p1143_p2, %p1137_p13 }
  0x45   :  { %1147 = shalt.err (!%p1144_p3)
}
  0x46   :  { %34 = dma.hbm_to_vmem [thread:$0]  %s1542_s0, 128, %s32_s30, [#allocation3]  }
  0x47   :  { %s1148_s4 = scalar_lea.hbm %s1544_s2, 2048 }
  0x48   :  { %p1149_p4 = scmp.ne.s32.totalorder %s1544_s2, %s1148_s4  ;;  %p1152_p5 = scmp.lt.u32.totalorder %s1148_s4, %s1544_s2 }
  0x4a   :  { %p1154_p6 = pnand %p1152_p5, %p1149_p4 }
  0x4c   :  { %1157 = shalt.err (!%p1154_p6)
}
  0x4d   :  { %s1158_s17 = scalar_lea.vmem %s51_s1, 2048  ;;  %p1163_p8 = scmp.lt.s32.totalorder %s51_s1, %s51_s1 }
  0x4e   :  { %p1159_p7 = scmp.ne.s32.totalorder %s51_s1, %s1158_s17  ;;  %p1164_p9 = scmp.lt.s32.totalorder %s1158_s17, %s1158_s17 }
  0x50   :  { %p1165_p10 = por %p1164_p9, %p1163_p8 }
  0x52   :  { %p1166_p11 = pnand %p1165_p10, %p1159_p7 }
  0x54   :  { %1169 = shalt.err (!%p1166_p11)
}
  0x55   :  { %56 = dma.hbm_to_vmem [thread:$0]  %s1544_s2, 2048, %s51_s1, [#allocation6], %s1273_s26, %s1273_s26, %s1274_s15  }
  0x56   :  { %s1277_s18 = smov [#allocation10]   ;;  %s1278_s20 = smov [#allocation13]  }
  0x57   :  { %s78_s19 = sshll.u32 %s1277_s18, 4  ;;  %s106_s22 = sshll.u32 %s1278_s20, 4  ;;  %s79_s19 = int_to_ptr.vmem [resolvable:$true] %s78_s19  ;;  %s107_s22 = int_to_ptr.vmem [resolvable:$true] %s106_s22 }
  0x58   :  { %s1170_s23 = scalar_lea.hbm %s1548_s6, 2048 }
  0x59   :  { %p1171_p12 = scmp.ne.s32.totalorder %s1548_s6, %s1170_s23  ;;  %p1174_p13 = scmp.lt.u32.totalorder %s1170_s23, %s1548_s6 }
  0x5b   :  { %p1176_p0 = pnand %p1174_p13, %p1171_p12 }
  0x5d   :  { %1179 = shalt.err (!%p1176_p0)
}
  0x5e   :  { %s1180_s2 = scalar_lea.vmem %s79_s19, 2048  ;;  %p1185_p2 = scmp.lt.s32.totalorder %s79_s19, %s79_s19 }
  0x5f   :  { %p1181_p1 = scmp.ne.s32.totalorder %s79_s19, %s1180_s2  ;;  %p1186_p3 = scmp.lt.s32.totalorder %s1180_s2, %s1180_s2 }
  0x61   :  { %p1187_p4 = por %p1186_p3, %p1185_p2 }
  0x63   :  { %p1188_p5 = pnand %p1187_p4, %p1181_p1 }
  0x65   :  { %1191 = shalt.err (!%p1188_p5)
}
  0x66   :  { %84 = dma.hbm_to_vmem [thread:$0]  %s1548_s6, 2048, %s79_s19, [#allocation9], %s1273_s26, %s1273_s26, %s1274_s15  }
  0x67   :  { %s1192_s16 = scalar_lea.hbm %s1552_s10, 2048 }
  0x68   :  { %p1193_p6 = scmp.ne.s32.totalorder %s1552_s10, %s1192_s16  ;;  %p1196_p7 = scmp.lt.u32.totalorder %s1192_s16, %s1552_s10 }
  0x6a   :  { %p1198_p8 = pnand %p1196_p7, %p1193_p6 }
  0x6c   :  { %1201 = shalt.err (!%p1198_p8)
}
  0x6d   :  { %s1202_s20 = scalar_lea.vmem %s107_s22, 2048  ;;  %p1207_p10 = scmp.lt.s32.totalorder %s107_s22, %s107_s22 }
  0x6e   :  { %p1203_p9 = scmp.ne.s32.totalorder %s107_s22, %s1202_s20  ;;  %p1208_p11 = scmp.lt.s32.totalorder %s1202_s20, %s1202_s20 }
  0x70   :  { %p1209_p12 = por %p1208_p11, %p1207_p10 }
  0x72   :  { %p1210_p13 = pnand %p1209_p12, %p1203_p9 }
  0x74   :  { %1213 = shalt.err (!%p1210_p13)
}
  0x75   :  { %112 = dma.hbm_to_vmem [thread:$0]  %s1552_s10, 2048, %s107_s22, [#allocation12], %s1273_s26, %s1273_s26, %s1274_s15  }
  0x76   :  { %1258 = dma.done.wait [#allocation3], 128  }
  0x77   :  { %1259 = vsyncadd [#allocation3], 4294967168 }
  0x78   :  { %1260 = dma.done.wait [#allocation6], 2176  }
  0x79   :  { %1261 = vsyncadd [#allocation6], 4294965120 }
  0x7a   :  { %1262 = dma.done.wait [#allocation9], 4096  }
  0x7b   :  { %1263 = vsyncadd [#allocation9], 4294963200 }
  0x7c   :  { %1264 = dma.done.wait [#allocation12], 4096  }
  0x7d   :  { %1265 = vsyncadd [#allocation12], 4294963200  ;;  %v1279_v0 = vmov 0.0|0.0   ;;  %vm1280_vm0 = vmmov 0   ;;  %v1281_v1 = vmov 0.0   ;;  %v137_v2 = vld [vmem:[#allocation7] sm:$0xff] }
  0x7e   :  { %922 = vmatprep.subr.bf16.mxu0 %v1279_v0  ;;  %779 = vmatprep.mubr.msk.f32.mxu0 %vm1280_vm0, %v1281_v1  ;;  %v138_v3 = vld [vmem:[#allocation7 + $0x8] sm:$0xff]  ;;  %v139_v4 = vld [vmem:[#allocation7 + $0x10] sm:$0xff]  ;;  %v140_v6 = vld [vmem:[#allocation7 + $0x18] sm:$0xff]  ;;  %s1282_s8 = smov [#allocation15]  }
  0x7f   :  { %946 = vmatprep.subr.bf16.mxu1 %v1279_v0  ;;  %814 = vmatprep.mubr.msk.f32.mxu1 %vm1280_vm0, %v1281_v1  ;;  %v923_v5 = vpack.c.bf16 %v138_v3, %v137_v2  ;;  %v926_v7 = vpack.c.bf16 %v140_v6, %v139_v4  ;;  %v141_v8 = vld [vmem:[#allocation7 + $0x20] sm:$0xff]  ;;  %v142_v9 = vld [vmem:[#allocation7 + $0x28] sm:$0xff]  ;;  %v235_v12 = vld [vmem:[#allocation8 + $0x10] sm:$0xff]  ;;  %s641_s23 = sshll.u32 %s1282_s8, 4  ;;  %s642_s23 = int_to_ptr.vmem [resolvable:$true] %s641_s23 }
  0x80   :  { %v233_v10 = vld [vmem:[#allocation8] sm:$0xff]  ;;  %v234_v11 = vld [vmem:[#allocation8 + $0x8] sm:$0xff]  ;;  %v236_v13 = vld [vmem:[#allocation8 + $0x18] sm:$0xff]  ;;  %v929_v14 = vpack.c.bf16 %v142_v9, %v141_v8  ;;  %s1214_s25 = scalar_lea.vmem %s642_s23, 128  ;;  %p1219_p1 = scmp.lt.s32.totalorder %s642_s23, %s642_s23 }
  0x81   :  { %924 = vmatpush3.bf16.msra.mxu0 %v923_v5  ;;  %v947_v15 = vpack.c.bf16 %v234_v11, %v233_v10  ;;  %v143_v16 = vld [vmem:[#allocation7 + $0x30] sm:$0xff]  ;;  %v144_v17 = vld [vmem:[#allocation7 + $0x38] sm:$0xff]  ;;  %v950_v18 = vpack.c.bf16 %v236_v13, %v235_v12  ;;  %v237_v19 = vld [vmem:[#allocation8 + $0x20] sm:$0xff]  ;;  %p1215_p0 = scmp.ne.s32.totalorder %s642_s23, %s1214_s25  ;;  %p1220_p2 = scmp.lt.s32.totalorder %s1214_s25, %s1214_s25 }
  0x82   :  { %925 = vmatprep.subr.bf16.mxu0 %v1279_v0  ;;  %v238_v20 = vld [vmem:[#allocation8 + $0x28] sm:$0xff]  ;;  %v932_v21 = vpack.c.bf16 %v144_v17, %v143_v16  ;;  %v145_v22 = vld [vmem:[#allocation7 + $0x40] sm:$0xff]  ;;  %v239_v25 = vld [vmem:[#allocation8 + $0x30] sm:$0xff] }
  0x83   :  { %948 = vmatpush3.bf16.msra.mxu1 %v947_v15  ;;  %v146_v23 = vld [vmem:[#allocation7 + $0x48] sm:$0xff]  ;;  %v953_v24 = vpack.c.bf16 %v238_v20, %v237_v19  ;;  %v240_v26 = vld [vmem:[#allocation8 + $0x38] sm:$0xff]  ;;  %v147_v28 = vld [vmem:[#allocation7 + $0x50] sm:$0xff]  ;;  %p1221_p3 = por %p1220_p2, %p1219_p1 }
  0x84   :  { %949 = vmatprep.subr.bf16.mxu1 %v1279_v0  ;;  %v935_v27 = vpack.c.bf16 %v146_v23, %v145_v22  ;;  %v148_v29 = vld [vmem:[#allocation7 + $0x58] sm:$0xff]  ;;  %v956_v30 = vpack.c.bf16 %v240_v26, %v239_v25  ;;  %v241_v31 = vld [vmem:[#allocation8 + $0x40] sm:$0xff]  ;;  %v242_v32 = vld [vmem:[#allocation8 + $0x48] sm:$0xff] }
  0x85   :  { %927 = vmatpush3.bf16.msra.mxu0 %v926_v7  ;;  %v938_v33 = vpack.c.bf16 %v148_v29, %v147_v28  ;;  %v149_v34 = vld [vmem:[#allocation7 + $0x60] sm:$0xff]  ;;  %v150_v35 = vld [vmem:[#allocation7 + $0x68] sm:$0xff]  ;;  %v959_v36 = vpack.c.bf16 %v242_v32, %v241_v31  ;;  %v243_v37 = vld [vmem:[#allocation8 + $0x50] sm:$0xff]  ;;  %p1222_p4 = pnand %p1221_p3, %p1215_p0 }
  0x86   :  { %928 = vmatprep.subr.bf16.mxu0 %v1279_v0  ;;  %v244_v38 = vld [vmem:[#allocation8 + $0x58] sm:$0xff]  ;;  %v941_v39 = vpack.c.bf16 %v150_v35, %v149_v34  ;;  %v151_v40 = vld [vmem:[#allocation7 + $0x70] sm:$0xff]  ;;  %v245_v43 = vld [vmem:[#allocation8 + $0x60] sm:$0xff] }
  0x87   :  { %951 = vmatpush3.bf16.msra.mxu1 %v950_v18  ;;  %v152_v41 = vld [vmem:[#allocation7 + $0x78] sm:$0xff]  ;;  %v962_v42 = vpack.c.bf16 %v244_v38, %v243_v37  ;;  %v246_v44 = vld [vmem:[#allocation8 + $0x68] sm:$0xff]  ;;  %v136_v47 = vld [vmem:[#allocation2] sm:$0xff] }
  0x88   :  { %952 = vmatprep.subr.bf16.mxu1 %v1279_v0  ;;  %v944_v45 = vpack.c.bf16 %v152_v41, %v151_v40  ;;  %v965_v46 = vpack.c.bf16 %v246_v44, %v245_v43  ;;  %v247_v48 = vld [vmem:[#allocation8 + $0x70] sm:$0xff]  ;;  %v248_v49 = vld [vmem:[#allocation8 + $0x78] sm:$0xff]  ;;  %v329_v51 = vld [vmem:[#allocation10] sm:$0xff] }
  0x89   :  { %930 = vmatpush3.bf16.msra.mxu0 %v929_v14  ;;  %v968_v50 = vpack.c.bf16 %v248_v49, %v247_v48  ;;  %v330_v52 = vld [vmem:[#allocation10 + $0x8] sm:$0xff]  ;;  %v331_v53 = vld [vmem:[#allocation10 + $0x10] sm:$0xff]  ;;  %v332_v55 = vld [vmem:[#allocation10 + $0x18] sm:$0xff] }
  0x8a   :  { %931 = vmatprep.subr.bf16.mxu0 %v1279_v0  ;;  %v971_v54 = vpack.c.bf16 %v330_v52, %v329_v51  ;;  %v974_v56 = vpack.c.bf16 %v332_v55, %v331_v53  ;;  %v333_v57 = vld [vmem:[#allocation10 + $0x20] sm:$0xff]  ;;  %v334_v58 = vld [vmem:[#allocation10 + $0x28] sm:$0xff]  ;;  %v335_v60 = vld [vmem:[#allocation10 + $0x30] sm:$0xff] }
  0x8b   :  { %954 = vmatpush3.bf16.msra.mxu1 %v953_v24  ;;  %v977_v59 = vpack.c.bf16 %v334_v58, %v333_v57  ;;  %v336_v61 = vld [vmem:[#allocation10 + $0x38] sm:$0xff]  ;;  %v337_v63 = vld [vmem:[#allocation10 + $0x40] sm:$0xff]  ;;  %v338_v2 = vld [vmem:[#allocation10 + $0x48] sm:$0xff] }
  0x8c   :  { %955 = vmatprep.subr.bf16.mxu1 %v1279_v0  ;;  %v980_v62 = vpack.c.bf16 %v336_v61, %v335_v60  ;;  %v983_v3 = vpack.c.bf16 %v338_v2, %v337_v63  ;;  %v339_v4 = vld [vmem:[#allocation10 + $0x50] sm:$0xff]  ;;  %v340_v5 = vld [vmem:[#allocation10 + $0x58] sm:$0xff]  ;;  %v341_v7 = vld [vmem:[#allocation10 + $0x60] sm:$0xff] }
  0x8d   :  { %933 = vmatpush3.bf16.msra.mxu0 %v932_v21  ;;  %v986_v6 = vpack.c.bf16 %v340_v5, %v339_v4  ;;  %v342_v8 = vld [vmem:[#allocation10 + $0x68] sm:$0xff]  ;;  %v657_v10 = vld [vmem:[%s1545_s3] ss:$0 sm:$0xff]  ;;  %v344_v17 = vld [vmem:[#allocation10 + $0x78] sm:$0xff] }
  0x8e   :  { %934 = vmatprep.subr.bf16.mxu0 %v1279_v0  ;;  %v989_v9 = vpack.c.bf16 %v342_v8, %v341_v7  ;;  %v343_v16 = vld [vmem:[#allocation10 + $0x70] sm:$0xff]  ;;  %v433_v19 = vld [vmem:[#allocation11] sm:$0xff]  ;;  %v434_v20 = vld [vmem:[#allocation11 + $0x8] sm:$0xff]  ;;  %v422_v7 = vlaneseq }
  0x8f   :  { %957 = vmatpush3.bf16.msra.mxu1 %v956_v30  ;;  %v992_v18 = vpack.c.bf16 %v344_v17, %v343_v16  ;;  %v435_v21 = vld [vmem:[#allocation11 + $0x10] sm:$0xff]  ;;  %v995_v22 = vpack.c.bf16 %v434_v20, %v433_v19  ;;  %v436_v23 = vld [vmem:[#allocation11 + $0x18] sm:$0xff]  ;;  %v437_v31 = vld [vmem:[#allocation11 + $0x20] sm:$0xff] }
  0x90   :  { %958 = vmatprep.subr.bf16.mxu1 %v1279_v0  ;;  %v998_v24 = vpack.c.bf16 %v436_v23, %v435_v21  ;;  %v658_v25 = vld [vmem:[%s1547_s5] ss:$0 sm:$0xff]  ;;  %v438_v32 = vld [vmem:[#allocation11 + $0x28] sm:$0xff]  ;;  %v440_v35 = vld [vmem:[#allocation11 + $0x38] sm:$0xff]  ;;  %v423_v8 = vand.u32 127, %v422_v7 }
  0x91   :  { %936 = vmatpush3.bf16.msra.mxu0 %v935_v27  ;;  %v439_v34 = vld [vmem:[#allocation11 + $0x30] sm:$0xff]  ;;  %v441_v37 = vld [vmem:[#allocation11 + $0x40] sm:$0xff]  ;;  %v442_v38 = vld [vmem:[#allocation11 + $0x48] sm:$0xff] }
  0x92   :  { %937 = vmatprep.subr.bf16.mxu0 %v1279_v0  ;;  %v443_v40 = vld [vmem:[#allocation11 + $0x50] sm:$0xff]  ;;  %v446_v43 = vld [vmem:[#allocation11 + $0x68] sm:$0xff]  ;;  %v529_v48 = vld [vmem:[#allocation13] sm:$0xff]  ;;  %vm424_vm3 = vcmp.lt.s32.totalorder %v423_v8, 16 }
  0x93   :  { %960 = vmatpush3.bf16.msra.mxu1 %v959_v36  ;;  %v1004_v36 = vpack.c.bf16 %v440_v35, %v439_v34  ;;  %v530_v49 = vld [vmem:[#allocation13 + $0x8] sm:$0xff]  ;;  %v532_v52 = vld [vmem:[#allocation13 + $0x18] sm:$0xff]  ;;  %v535_v57 = vld [vmem:[#allocation13 + $0x30] sm:$0xff] }
  0x94   :  { %961 = vmatprep.subr.bf16.mxu1 %v1279_v0  ;;  %v1019_v51 = vpack.c.bf16 %v530_v49, %v529_v48  ;;  %v534_v55 = vld [vmem:[#allocation13 + $0x28] sm:$0xff]  ;;  %v536_v58 = vld [vmem:[#allocation13 + $0x38] sm:$0xff]  ;;  %v537_v60 = vld [vmem:[#allocation13 + $0x40] sm:$0xff] }
  0x95   :  { %939 = vmatpush3.bf16.msra.mxu0 %v938_v33  ;;  %v1001_v33 = vpack.c.bf16 %v438_v32, %v437_v31  ;;  %v538_v61 = vld [vmem:[#allocation13 + $0x48] sm:$0xff]  ;;  %v539_v63 = vld [vmem:[#allocation13 + $0x50] sm:$0xff]  ;;  %v540_v2 = vld [vmem:[#allocation13 + $0x58] sm:$0xff] }
  0x96   :  { %940 = vmatprep.subr.bf16.mxu0 %v1279_v0  ;;  %v541_v4 = vld [vmem:[#allocation13 + $0x60] sm:$0xff]  ;;  %v542_v5 = vld [vmem:[#allocation13 + $0x68] sm:$0xff]  ;;  %v427_v17 = vld [vmem:[#allocation5] sm:$0xff] }
  0x97   :  { %963 = vmatpush3.bf16.msra.mxu1 %v962_v42  ;;  %v445_v42 = vld [vmem:[#allocation11 + $0x60] sm:$0xff]  ;;  %v543_v20 = vld [vmem:[#allocation13 + $0x70] sm:$0xff]  ;;  %v544_v21 = vld [vmem:[#allocation13 + $0x78] sm:$0xff] }
  0x98   :  { %964 = vmatprep.subr.bf16.mxu1 %v1279_v0  ;;  %v1013_v44 = vpack.c.bf16 %v446_v43, %v445_v42  ;;  %v660_v23 = vld [vmem:[%s1551_s9] ss:$0 sm:$0xff] }
  0x99   :  { %942 = vmatpush3.bf16.msra.mxu0 %v941_v39  ;;  %v1007_v39 = vpack.c.bf16 %v442_v38, %v441_v37 }
  0x9a   :  { %943 = vmatprep.subr.bf16.mxu0 %v1279_v0 }
  0x9b   :  { %966 = vmatpush3.bf16.msra.mxu1 %v965_v46  ;;  %v448_v46 = vld [vmem:[#allocation11 + $0x78] sm:$0xff] }
  0x9c   :  { %967 = vmatprep.subr.bf16.mxu1 %v1279_v0 }
  0x9d   :  { %945 = vmatpush3.bf16.msra.mxu0 %v944_v45  ;;  %v447_v45 = vld [vmem:[#allocation11 + $0x70] sm:$0xff] }
  0x9e   :  { %970 = vmatprep.subr.bf16.mxu0 %v1279_v0 }
  0x9f   :  { %969 = vmatpush3.bf16.msra.mxu1 %v968_v50  ;;  %v531_v50 = vld [vmem:[#allocation13 + $0x10] sm:$0xff] }
  0xa0   :  { %780 = vmatmul.mubr.f32.vlgmr.msra.gmra.mrb[0].mxu0 %v136_v47  ;;  %994 = vmatprep.subr.bf16.mxu1 %v1279_v0  ;;  %v1016_v47 = vpack.c.bf16 %v448_v46, %v447_v45  ;;  %v1022_v53 = vpack.c.bf16 %v532_v52, %v531_v50 }
  0xa1   :  { %849 = vmatprep.mubr.msk.f32.mxu0 %vm1280_vm0, %v1281_v1  ;;  %972 = vmatpush3.bf16.msra.mxu0 %v971_v54  ;;  %v533_v54 = vld [vmem:[#allocation13 + $0x20] sm:$0xff] }
  0xa2   :  { %973 = vmatprep.subr.bf16.mxu0 %v1279_v0 }
  0xa5   :  { %975 = vmatpush3.bf16.msra.mxu0 %v974_v56  ;;  %v1025_v56 = vpack.c.bf16 %v534_v55, %v533_v54 }
  0xa6   :  { %976 = vmatprep.subr.bf16.mxu0 %v1279_v0 }
  0xa9   :  { %978 = vmatpush3.bf16.msra.mxu0 %v977_v59  ;;  %v1028_v59 = vpack.c.bf16 %v536_v58, %v535_v57 }
  0xaa   :  { %979 = vmatprep.subr.bf16.mxu0 %v1279_v0 }
  0xad   :  { %981 = vmatpush3.bf16.msra.mxu0 %v980_v62  ;;  %v1031_v62 = vpack.c.bf16 %v538_v61, %v537_v60 }
  0xae   :  { %982 = vmatprep.subr.bf16.mxu0 %v1279_v0 }
  0xb1   :  { %984 = vmatpush3.bf16.msra.mxu0 %v983_v3  ;;  %v1034_v3 = vpack.c.bf16 %v540_v2, %v539_v63 }
  0xb2   :  { %985 = vmatprep.subr.bf16.mxu0 %v1279_v0 }
  0xb5   :  { %987 = vmatpush3.bf16.msra.mxu0 %v986_v6  ;;  %v1037_v6 = vpack.c.bf16 %v542_v5, %v541_v4 }
  0xb6   :  { %988 = vmatprep.subr.bf16.mxu0 %v1279_v0 }
  0xb9   :  { %990 = vmatpush3.bf16.msra.mxu0 %v989_v9  ;;  %v659_v9 = vld [vmem:[%s1549_s7] ss:$0 sm:$0xff] }
  0xba   :  { %991 = vmatprep.subr.bf16.mxu0 %v1279_v0 }
  0xbd   :  { %993 = vmatpush3.bf16.msra.mxu0 %v992_v18 }
  0xbe   :  { %1018 = vmatprep.subr.bf16.mxu0 %v1279_v0 }
 0x173   :  { %v226_v11 = vpop.f32.mrb[0].mxu0 }
 0x174   :  { %v227_v12 = vadd.f32 %v657_v10, %v226_v11  ;;  %v781_v13 = vpop.f32.mrb[1].mxu0 }
 0x176   :  { %v231_v14 = vmul.f32 0.01, %v227_v12  ;;  %vm230_vm1 = vcmp.ge.f32.partialorder %v227_v12, 0.0 }
 0x178   :  { %v232_v15 = vsel %vm230_vm1, %v227_v12, %v231_v14 }
 0x179   :  { %815 = vmatmul.mubr.f32.vlgmr.msra.gmra.mrb[0].mxu1 %v232_v15 }
 0x17a   :  { %884 = vmatprep.mubr.msk.f32.mxu1 %vm1280_vm0, %v1281_v1  ;;  %996 = vmatpush3.bf16.msra.mxu1 %v995_v22  ;;  %v1040_v22 = vpack.c.bf16 %v544_v21, %v543_v20 }
 0x17b   :  { %997 = vmatprep.subr.bf16.mxu1 %v1279_v0 }
 0x17e   :  { %999 = vmatpush3.bf16.msra.mxu1 %v998_v24 }
 0x17f   :  { %1000 = vmatprep.subr.bf16.mxu1 %v1279_v0 }
 0x182   :  { %1002 = vmatpush3.bf16.msra.mxu1 %v1001_v33 }
 0x183   :  { %1003 = vmatprep.subr.bf16.mxu1 %v1279_v0 }
 0x186   :  { %1005 = vmatpush3.bf16.msra.mxu1 %v1004_v36 }
 0x187   :  { %1006 = vmatprep.subr.bf16.mxu1 %v1279_v0 }
 0x18a   :  { %1008 = vmatpush3.bf16.msra.mxu1 %v1007_v39 }
 0x18b   :  { %1009 = vmatprep.subr.bf16.mxu1 %v1279_v0 }
 0x24c   :  { %v322_v26 = vpop.f32.mrb[0].mxu1 }
 0x24d   :  { %v323_v27 = vadd.f32 %v658_v25, %v322_v26  ;;  %v816_v28 = vpop.f32.mrb[1].mxu1 }
 0x24f   :  { %vm326_vm2 = vcmp.ge.f32.partialorder %v323_v27, 0.0  ;;  %v327_v29 = vmul.f32 0.01, %v323_v27 }
 0x251   :  { %v328_v30 = vsel %vm326_vm2, %v323_v27, %v327_v29 }
 0x252   :  { %850 = vmatmul.mubr.f32.vlgmr.msra.gmra.mrb[2].mxu0 %v328_v30 }
 0x253   :  { %919 = vmatprep.mubr.msk.f32.mxu0 %vm1280_vm0, %v1281_v1  ;;  %v444_v1 = vld [vmem:[#allocation11 + $0x58] sm:$0xff]  ;;  %1020 = vmatpush3.bf16.msra.mxu0 %v1019_v51 }
 0x254   :  { %v1010_v41 = vpack.c.bf16 %v444_v1, %v443_v40  ;;  %1021 = vmatprep.subr.bf16.mxu0 %v1279_v0 }
 0x256   :  { %1011 = vmatpush3.bf16.msra.mxu1 %v1010_v41 }
 0x257   :  { %1012 = vmatprep.subr.bf16.mxu1 %v1279_v0  ;;  %1023 = vmatpush3.bf16.msra.mxu0 %v1022_v53 }
 0x258   :  { %1024 = vmatprep.subr.bf16.mxu0 %v1279_v0 }
 0x25a   :  { %1014 = vmatpush3.bf16.msra.mxu1 %v1013_v44 }
 0x25b   :  { %1015 = vmatprep.subr.bf16.mxu1 %v1279_v0  ;;  %1026 = vmatpush3.bf16.msra.mxu0 %v1025_v56 }
 0x25c   :  { %1027 = vmatprep.subr.bf16.mxu0 %v1279_v0 }
 0x25e   :  { %1017 = vmatpush3.bf16.msra.mxu1 %v1016_v47 }
 0x25f   :  { %1029 = vmatpush3.bf16.msra.mxu0 %v1028_v59 }
 0x260   :  { %1030 = vmatprep.subr.bf16.mxu0 %v1279_v0 }
 0x263   :  { %1032 = vmatpush3.bf16.msra.mxu0 %v1031_v62 }
 0x264   :  { %1033 = vmatprep.subr.bf16.mxu0 %v1279_v0 }
 0x267   :  { %1035 = vmatpush3.bf16.msra.mxu0 %v1034_v3 }
 0x268   :  { %1036 = vmatprep.subr.bf16.mxu0 %v1279_v0 }
 0x26b   :  { %1038 = vmatpush3.bf16.msra.mxu0 %v1037_v6 }
 0x26c   :  { %1039 = vmatprep.subr.bf16.mxu0 %v1279_v0 }
 0x26f   :  { %1041 = vmatpush3.bf16.msra.mxu0 %v1040_v22 }
 0x325   :  { %v418_v10 = vpop.f32.mrb[2].mxu0 }
 0x326   :  { %v419_v11 = vadd.f32 %v659_v9, %v418_v10  ;;  %v851_v12 = vpop.f32.mrb[3].mxu0 }
 0x328   :  { %v425_v13 = vsel %vm424_vm3, %v419_v11, 0.0  ;;  %624 = vst [vmem:[#allocation15] sm:$0xff] %v419_v11 }
 0x329   :  { %v426_v14 = vsub.f32 %v419_v11, %v425_v13 }
 0x32b   :  { %v428_v15 = vmul.f32 0.5, %v426_v14 }
 0x32d   :  { %v429_v16 = vmul.f32 1.442695, %v428_v15 }
 0x32f   :  { %1056 = vpow2.f32 %v429_v16 }
 0x339   :  { %v1057_v18 = vpop.eup %1056 }
 0x33a   :  { %v431_v19 = vmul.f32 %v1057_v18, %v427_v17 }
 0x33c   :  { %v432_v0 = vadd.f32 %v431_v19, %v425_v13 }
 0x33e   :  { %885 = vmatmul.mubr.f32.vlgmr.msra.gmra.mrb[2].mxu1 %v432_v0 }
 0x411   :  { %v522_v24 = vpop.f32.mrb[2].mxu1 }
 0x412   :  { %v523_v25 = vadd.f32 %v660_v23, %v522_v24  ;;  %v886_v26 = vpop.f32.mrb[3].mxu1 }
 0x414   :  { %vm526_vm4 = vcmp.ge.f32.partialorder %v523_v25, 0.0  ;;  %v527_v27 = vmul.f32 0.01, %v523_v25 }
 0x416   :  { %v528_v28 = vsel %vm526_vm4, %v523_v25, %v527_v27 }
 0x417   :  { %920 = vmatmul.mubr.f32.vlgmr.msra.gmra.mrb[4].mxu0 %v528_v28 }
 0x418   :  { %1225 = shalt.err (!%p1222_p4)
}
 0x419   :  { %s1226_s9 = scalar_lea.hbm %s1555_s13, 128 }
 0x41a   :  { %p1227_p5 = scmp.ne.s32.totalorder %s1555_s13, %s1226_s9  ;;  %p1230_p6 = scmp.lt.u32.totalorder %s1226_s9, %s1555_s13 }
 0x41c   :  { %p1232_p7 = pnand %p1230_p6, %p1227_p5 }
 0x41e   :  { %1235 = shalt.err (!%p1232_p7)
}
 0x41f   :  { %644 = dma.vmem_to_hbm [thread:$0]  %s642_s23, 128, %s1555_s13, [#allocation16]   ;;  %v661_v29 = vld [vmem:[%s1553_s11] ss:$0 sm:$0xff] }
 0x420   :  { %s1283_s0 = smov [#allocation14]  }
 0x421   :  { %s631_s30 = sshll.u32 %s1283_s0, 4  ;;  %s632_s30 = int_to_ptr.vmem [resolvable:$true] %s631_s30 }
 0x422   :  { %s1236_s18 = scalar_lea.vmem %s632_s30, 128  ;;  %p1241_p9 = scmp.lt.s32.totalorder %s632_s30, %s632_s30 }
 0x423   :  { %p1237_p8 = scmp.ne.s32.totalorder %s632_s30, %s1236_s18  ;;  %p1242_p10 = scmp.lt.s32.totalorder %s1236_s18, %s1236_s18 }
 0x425   :  { %p1243_p11 = por %p1242_p10, %p1241_p9 }
 0x427   :  { %p1244_p12 = pnand %p1243_p11, %p1237_p8 }
 0x4ea   :  { %v618_v30 = vpop.f32.mrb[4].mxu0 }
 0x4eb   :  { %v619_v31 = vadd.f32 %v661_v29, %v618_v30  ;;  %v921_v32 = vpop.f32.mrb[5].mxu0 }
 0x4ed   :  { %1058 = vtanh.f32 %v619_v31 }
 0x4f7   :  { %v1059_v33 = vpop.eup %1058 }
 0x4f8   :  { %623 = vst [vmem:[#allocation14] sm:$0xff] %v1059_v33 }
 0x4f9   :  { %1247 = shalt.err (!%p1244_p12)
}
 0x4fa   :  { %s1248_s11 = scalar_lea.hbm %s1554_s12, 128 }
 0x4fb   :  { %p1249_p13 = scmp.ne.s32.totalorder %s1554_s12, %s1248_s11  ;;  %p1252_p0 = scmp.lt.u32.totalorder %s1248_s11, %s1554_s12 }
 0x4fd   :  { %p1254_p1 = pnand %p1252_p0, %p1249_p13 }
 0x4ff   :  { %1257 = shalt.err (!%p1254_p1)
}
 0x500   :  { %634 = dma.vmem_to_hbm [thread:$0]  %s632_s30, 128, %s1554_s12, [#allocation4]  }
 0x501   :  { %1266 = dma.done.wait [#allocation4], 128  }
 0x502   :  { %1267 = vsyncadd [#allocation4], 4294967168 }
 0x503   :  { %1268 = dma.done.wait [#allocation16], 128  }
 0x504   :  { %1269 = vsyncadd [#allocation16], 4294967168 }
 0x505   :  { %651 = vsyncpa [#allocation3], 1 }
 0x506   :  { %652 = vsyncpa [#allocation6], 1 }
 0x507   :  { %653 = vsyncpa [#allocation9], 1 }
 0x508   :  { %654 = vsyncpa [#allocation12], 1 }
 0x509   :  { %655 = vsyncpa [#allocation4], 1 }
 0x50a   :  { %656 = vsyncpa [#allocation16], 1 }

</bundles_post_ra>
